<compile_context>
chip_gen: v5e
topology: v5e:2x2
jax: 0.10.0
libtpu: 0.0.40
codegen_flags: <defaults>
</compile_context>

<pallas_src>
import jax
import jax.numpy as jnp
from jax.experimental import pallas as pl
from jax.experimental.pallas import tpu as pltpu

DEFOG_RANGE = (0.1, 1.0)   # deterministic in-script choice for defog_range
_LANES = 128               # lane width of the flattened spatial layout
_TARGET_ROW_TILE = 1024    # sublane rows per spatial tile (multiple of 8)


def defog_kernel(p_ref, a_ref, img_ref, ica_ref, out_ref):
    # p_ref:   SMEM (B,)             -- already tanh_range-transformed param
    # a_ref:   SMEM (B, C)           -- atmospheric light per channel (f32)
    # img_ref: VMEM (1, C, TR, 128)  -- lane-dense spatial tile of one image
    # ica_ref: VMEM (1, 1, TR, 128)  -- matching IcA (dark-channel) tile
    # out_ref: VMEM (1, C, TR, 128)
    b = pl.program_id(0)
    p = p_ref[b]

    # Transmission map for this tile; clamp *before* the divide, like the
    # reference torch.maximum(tx_1, 0.01).  Computed once, reused for all C.
    tx = jnp.maximum(1.0 - p * ica_ref[0, 0].astype(jnp.float32),
                     jnp.float32(0.01))                       # (TR, 128)
    inv_tx = 1.0 / tx                                         # exact reciprocal

    C = img_ref.shape[1]
    for c in range(C):  # static loop, C == 3; each store is full-lane dense
        a_c = a_ref[b, c]
        out_ref[0, c] = ((img_ref[0, c].astype(jnp.float32) - a_c) * inv_tx
                         + a_c).astype(out_ref.dtype)


def defog_filter(img, param, defog_A, IcA, *, defog_range=DEFOG_RANGE):
    B, C, H, W = img.shape
    l, r = defog_range

    # Hoist tanh_range out of the kernel (tiny B-length op in XLA).
    p = (jnp.tanh(param.astype(jnp.float32)) * 0.5 + 0.5) * (r - l) + l

    # Lane-dense layout: flatten spatial dims to (R, 128) lanes, padding the
    # flattened axis up to a multiple of 128 only when strictly necessary.
    N = H * W
    Np = pl.cdiv(N, _LANES) * _LANES
    img_f = img.reshape(B, C, N)
    ica_f = IcA.reshape(B, 1, N)
    if Np != N:
        pad = Np - N
        img_f = jnp.pad(img_f, ((0, 0), (0, 0), (0, pad)))
        ica_f = jnp.pad(ica_f, ((0, 0), (0, 0), (0, pad)))
    R = Np // _LANES
    img4 = img_f.reshape(B, C, R, _LANES)
    ica4 = ica_f.reshape(B, 1, R, _LANES)

    # Spatial row tile: whole array if small (full-extent block is always
    # legal), else a multiple-of-8 row count that keeps tiles ~1.5 MiB.
    tr = R if R <= _TARGET_ROW_TILE else _TARGET_ROW_TILE
    n_tiles = pl.cdiv(R, tr)

    itemsize = jnp.dtype(img.dtype).itemsize
    bytes_accessed = (2 * B * C * Np + B * Np) * itemsize      # img in/out + IcA
    cost = pl.CostEstimate(flops=B * Np * (2 + 3 * C),
                           transcendentals=0,
                           bytes_accessed=bytes_accessed)

    out4 = pl.pallas_call(
        defog_kernel,
        out_shape=jax.ShapeDtypeStruct((B, C, R, _LANES), img.dtype),
        grid=(B, n_tiles),
        in_specs=[
            pl.BlockSpec(memory_space=pltpu.SMEM),                        # p (B,)
            pl.BlockSpec(memory_space=pltpu.SMEM),                        # defog_A (B, C)
            pl.BlockSpec((1, C, tr, _LANES), lambda b, t: (b, 0, t, 0)),  # img
            pl.BlockSpec((1, 1, tr, _LANES), lambda b, t: (b, 0, t, 0)),  # IcA
        ],
        out_specs=pl.BlockSpec((1, C, tr, _LANES), lambda b, t: (b, 0, t, 0)),
        compiler_params=pltpu.CompilerParams(
            dimension_semantics=("parallel", "parallel"),
            vmem_limit_bytes=48 * 1024 * 1024,
        ),
        cost_estimate=cost,
    )(p, defog_A.astype(jnp.float32), img4, ica4)

    return out4.reshape(B, C, Np)[:, :, :N].reshape(B, C, H, W)


def defog_filter_ref(img, param, defog_A, IcA, *, defog_range=DEFOG_RANGE):
    """Pure-JAX reference mirroring the PyTorch forward exactly."""
    l, r = defog_range
    p = (jnp.tanh(param) * 0.5 + 0.5) * (r - l) + l           # tanh_range
    tx = 1.0 - p[:, None, None, None] * IcA                    # (B,1,H,W)
    tx_1 = jnp.tile(tx, (1, img.shape[1], 1, 1))               # repeat(1,3,1,1)
    A_exp = defog_A[:, :, None, None] * jnp.ones_like(img)     # broadcast repeat
    return (img - A_exp) / jnp.maximum(tx_1, 0.01) + A_exp


if __name__ == "__main__":
    key = jax.random.PRNGKey(0)
    k1, k2, k3, k4 = jax.random.split(key, 4)

    # Primary test: module-native NCHW layout, C=3, H*W divisible by 128.
    B, C, H, W = 2, 3, 16, 16
    img = jax.random.uniform(k1, (B, C, H, W), jnp.float32)
    param = jax.random.normal(k2, (B,), jnp.float32)           # raw defog param
    defog_A = jax.random.uniform(k3, (B, C), jnp.float32)      # atmospheric light
    IcA = jax.random.uniform(k4, (B, 1, H, W), jnp.float32)    # dark-channel map

    out = jax.block_until_ready(defog_filter(img, param, defog_A, IcA))
    ref = defog_filter_ref(img, param, defog_A, IcA)
    assert out.shape == (B, C, H, W)
    assert jnp.allclose(out, ref, atol=1e-5, rtol=1e-5), "mismatch vs reference (main)"

    # Secondary test: H*W not a multiple of 128 exercises the lane-padding path.
    B2, H2, W2 = 1, 10, 12
    img2 = jax.random.uniform(k1, (B2, C, H2, W2), jnp.float32)
    param2 = jax.random.normal(k2, (B2,), jnp.float32)
    A2 = jax.random.uniform(k3, (B2, C), jnp.float32)
    IcA2 = jax.random.uniform(k4, (B2, 1, H2, W2), jnp.float32)

    out2 = jax.block_until_ready(defog_filter(img2, param2, A2, IcA2))
    ref2 = defog_filter_ref(img2, param2, A2, IcA2)
    assert out2.shape == (B2, C, H2, W2)
    assert jnp.allclose(out2, ref2, atol=1e-5, rtol=1e-5), "mismatch vs reference (padded)"

    # Third test: larger image that exercises multi-tile grid (R > 1 tile) and
    # verifies the ragged last-tile path stays correct.
    B3, H3, W3 = 2, 96, 160                                    # R = 120 rows
    img3 = jax.random.uniform(k1, (B3, C, H3, W3), jnp.float32)
    param3 = jax.random.normal(k2, (B3,), jnp.float32)
    A3 = jax.random.uniform(k3, (B3, C), jnp.float32)
    IcA3 = jax.random.uniform(k4, (B3, 1, H3, W3), jnp.float32)

    out3 = jax.block_until_ready(defog_filter(img3, param3, A3, IcA3))
    ref3 = defog_filter_ref(img3, param3, A3, IcA3)
    assert jnp.allclose(out3, ref3, atol=1e-5, rtol=1e-5), "mismatch vs reference (large)"

    print("KERNEL_OK")
</pallas_src>

<mosaic_0001>
module attributes {stable_mosaic.version = 11 : i64} {
  func.func @defog_kernel(%arg0: i32, %arg1: i32, %arg2: memref<2xf32, #tpu.memory_space<smem>>, %arg3: memref<2x3xf32, #tpu.memory_space<smem>>, %arg4: memref<1x3x2x128xf32, #tpu.memory_space<vmem>>, %arg5: memref<1x1x2x128xf32, #tpu.memory_space<vmem>>, %arg6: memref<1x3x2x128xf32, #tpu.memory_space<vmem>>) attributes {dimension_semantics = [#tpu.dimension_semantics<parallel>, #tpu.dimension_semantics<parallel>], iteration_bounds = array<i64: 2, 1>, scalar_prefetch = 0 : i64, scratch_operands = 0 : i64, tpu.core_type = #tpu.core_type<tc>, window_params = [{transform_indices = @transform_0, window_bounds = array<i64: 2>}, {transform_indices = @transform_1, window_bounds = array<i64: 2, 3>}, {transform_indices = @transform_2, window_bounds = array<i64: 1, 3, 2, 128>}, {transform_indices = @transform_3, window_bounds = array<i64: 1, 1, 2, 128>}, {transform_indices = @transform_4, window_bounds = array<i64: 1, 3, 2, 128>}]} {
    %0 = arith.index_cast %arg0 : i32 to index
    %1 = memref.load %arg2[%0] : memref<2xf32, #tpu.memory_space<smem>>
    %c0 = arith.constant 0 : index
    %c0_0 = arith.constant 0 : index
    %c0_1 = arith.constant 0 : index
    %c0_2 = arith.constant 0 : index
    %2 = vector.load %arg5[%c0, %c0_0, %c0_1, %c0_2] : memref<1x1x2x128xf32, #tpu.memory_space<vmem>>, vector<1x1x2x128xf32>
    %3 = vector.shape_cast %2 : vector<1x1x2x128xf32> to vector<2x128xf32>
    %4 = vector.broadcast %1 : f32 to vector<2x128xf32>
    %5 = arith.mulf %4, %3 : vector<2x128xf32>
    %cst = arith.constant 1.000000e+00 : f32
    %6 = vector.broadcast %cst : f32 to vector<2x128xf32>
    %7 = arith.subf %6, %5 : vector<2x128xf32>
    %cst_3 = arith.constant 0.00999999977 : f32
    %8 = vector.broadcast %cst_3 : f32 to vector<2x128xf32>
    %9 = arith.maximumf %7, %8 : vector<2x128xf32>
    %cst_4 = arith.constant 1.000000e+00 : f32
    %10 = vector.broadcast %cst_4 : f32 to vector<2x128xf32>
    %11 = arith.divf %10, %9 : vector<2x128xf32>
    %12 = arith.index_cast %arg0 : i32 to index
    %c0_5 = arith.constant 0 : index
    %13 = memref.load %arg3[%12, %c0_5] : memref<2x3xf32, #tpu.memory_space<smem>>
    %c0_6 = arith.constant 0 : index
    %c0_7 = arith.constant 0 : index
    %c0_8 = arith.constant 0 : index
    %c0_9 = arith.constant 0 : index
    %14 = vector.load %arg4[%c0_6, %c0_7, %c0_8, %c0_9] : memref<1x3x2x128xf32, #tpu.memory_space<vmem>>, vector<1x1x2x128xf32>
    %15 = vector.shape_cast %14 : vector<1x1x2x128xf32> to vector<2x128xf32>
    %16 = vector.broadcast %13 : f32 to vector<2x128xf32>
    %17 = arith.subf %15, %16 : vector<2x128xf32>
    %18 = arith.mulf %17, %11 : vector<2x128xf32>
    %19 = vector.broadcast %13 : f32 to vector<2x128xf32>
    %20 = arith.addf %18, %19 : vector<2x128xf32>
    %c0_10 = arith.constant 0 : index
    %c0_11 = arith.constant 0 : index
    %c0_12 = arith.constant 0 : index
    %c0_13 = arith.constant 0 : index
    %21 = vector.load %arg6[%c0_10, %c0_11, %c0_12, %c0_13] : memref<1x3x2x128xf32, #tpu.memory_space<vmem>>, vector<1x1x2x128xf32>
    %22 = vector.shape_cast %21 : vector<1x1x2x128xf32> to vector<2x128xf32>
    %23 = vector.shape_cast %20 : vector<2x128xf32> to vector<1x1x2x128xf32>
    tpu.vector_store %arg6[%c0_10, %c0_11, %c0_12, %c0_13], %23 {strides = array<i32>} : memref<1x3x2x128xf32, #tpu.memory_space<vmem>>, vector<1x1x2x128xf32>,
    %24 = arith.index_cast %arg0 : i32 to index
    %c1 = arith.constant 1 : index
    %25 = memref.load %arg3[%24, %c1] : memref<2x3xf32, #tpu.memory_space<smem>>
    %c0_14 = arith.constant 0 : index
    %c1_15 = arith.constant 1 : index
    %c0_16 = arith.constant 0 : index
    %c0_17 = arith.constant 0 : index
    %26 = vector.load %arg4[%c0_14, %c1_15, %c0_16, %c0_17] : memref<1x3x2x128xf32, #tpu.memory_space<vmem>>, vector<1x1x2x128xf32>
    %27 = vector.shape_cast %26 : vector<1x1x2x128xf32> to vector<2x128xf32>
    %28 = vector.broadcast %25 : f32 to vector<2x128xf32>
    %29 = arith.subf %27, %28 : vector<2x128xf32>
    %30 = arith.mulf %29, %11 : vector<2x128xf32>
    %31 = vector.broadcast %25 : f32 to vector<2x128xf32>
    %32 = arith.addf %30, %31 : vector<2x128xf32>
    %c0_18 = arith.constant 0 : index
    %c1_19 = arith.constant 1 : index
    %c0_20 = arith.constant 0 : index
    %c0_21 = arith.constant 0 : index
    %33 = vector.load %arg6[%c0_18, %c1_19, %c0_20, %c0_21] : memref<1x3x2x128xf32, #tpu.memory_space<vmem>>, vector<1x1x2x128xf32>
    %34 = vector.shape_cast %33 : vector<1x1x2x128xf32> to vector<2x128xf32>
    %35 = vector.shape_cast %32 : vector<2x128xf32> to vector<1x1x2x128xf32>
    tpu.vector_store %arg6[%c0_18, %c1_19, %c0_20, %c0_21], %35 {strides = array<i32>} : memref<1x3x2x128xf32, #tpu.memory_space<vmem>>, vector<1x1x2x128xf32>,
    %36 = arith.index_cast %arg0 : i32 to index
    %c2 = arith.constant 2 : index
    %37 = memref.load %arg3[%36, %c2] : memref<2x3xf32, #tpu.memory_space<smem>>
    %c0_22 = arith.constant 0 : index
    %c2_23 = arith.constant 2 : index
    %c0_24 = arith.constant 0 : index
    %c0_25 = arith.constant 0 : index
    %38 = vector.load %arg4[%c0_22, %c2_23, %c0_24, %c0_25] : memref<1x3x2x128xf32, #tpu.memory_space<vmem>>, vector<1x1x2x128xf32>
    %39 = vector.shape_cast %38 : vector<1x1x2x128xf32> to vector<2x128xf32>
    %40 = vector.broadcast %37 : f32 to vector<2x128xf32>
    %41 = arith.subf %39, %40 : vector<2x128xf32>
    %42 = arith.mulf %41, %11 : vector<2x128xf32>
    %43 = vector.broadcast %37 : f32 to vector<2x128xf32>
    %44 = arith.addf %42, %43 : vector<2x128xf32>
    %c0_26 = arith.constant 0 : index
    %c2_27 = arith.constant 2 : index
    %c0_28 = arith.constant 0 : index
    %c0_29 = arith.constant 0 : index
    %45 = vector.load %arg6[%c0_26, %c2_27, %c0_28, %c0_29] : memref<1x3x2x128xf32, #tpu.memory_space<vmem>>, vector<1x1x2x128xf32>
    %46 = vector.shape_cast %45 : vector<1x1x2x128xf32> to vector<2x128xf32>
    %47 = vector.shape_cast %44 : vector<2x128xf32> to vector<1x1x2x128xf32>
    tpu.vector_store %arg6[%c0_26, %c2_27, %c0_28, %c0_29], %47 {strides = array<i32>} : memref<1x3x2x128xf32, #tpu.memory_space<vmem>>, vector<1x1x2x128xf32>,
    return
  }
  func.func @transform_0(%arg0: i32, %arg1: i32) -> i32 {
    %c0_i32 = arith.constant 0 : i32
    %c0_i32_0 = arith.constant 0 : i32
    return %c0_i32 : i32
  }
  func.func @transform_1(%arg0: i32, %arg1: i32) -> (i32, i32) {
    %c0_i32 = arith.constant 0 : i32
    %c0_i32_0 = arith.constant 0 : i32
    %c0_i32_1 = arith.constant 0 : i32
    return %c0_i32, %c0_i32_0 : i32, i32
  }
  func.func @transform_2(%arg0: i32, %arg1: i32) -> (i32, i32, i32, i32) {
    %c0_i32 = arith.constant 0 : i32
    %c0_i32_0 = arith.constant 0 : i32
    %c0_i32_1 = arith.constant 0 : i32
    return %arg0, %c0_i32, %arg1, %c0_i32_0 : i32, i32, i32, i32
  }
  func.func @transform_3(%arg0: i32, %arg1: i32) -> (i32, i32, i32, i32) {
    %c0_i32 = arith.constant 0 : i32
    %c0_i32_0 = arith.constant 0 : i32
    %c0_i32_1 = arith.constant 0 : i32
    return %arg0, %c0_i32, %arg1, %c0_i32_0 : i32, i32, i32, i32
  }
  func.func @transform_4(%arg0: i32, %arg1: i32) -> (i32, i32, i32, i32) {
    %c0_i32 = arith.constant 0 : i32
    %c0_i32_0 = arith.constant 0 : i32
    %c0_i32_1 = arith.constant 0 : i32
    return %arg0, %c0_i32, %arg1, %c0_i32_0 : i32, i32, i32, i32
  }
}

</mosaic_0001>

<bundles_post_ra>
// kernel: tpu_custom_call.1
= control target key start
LH: loop header
LB: loop body
LE: loop exit
PB: predicated region body
PF: predicated region fallthrough
CT: control target
= control target key end

     0   :  { %s1033_s0 = inlined_call_operand.hbm [shape: f32[2], index: 0, kind: input, shape index: {}]   ;;  %s1034_s1 = inlined_call_operand.hbm [shape: f32[2,3], index: 1, kind: input, shape index: {}]   ;;  %s1035_s2 = inlined_call_operand.hbm [shape: f32[2,3,2,128], index: 2, kind: input, shape index: {}]   ;;  %s1036_s3 = inlined_call_operand.hbm [shape: f32[2,1,2,128], index: 3, kind: input, shape index: {}]   ;;  %s1037_s4 = inlined_call_operand.hbm [shape: f32[2,3,2,128], index: 4, kind: output, shape index: {}]  }
   0x1   :  { %1039 = sst [smem:[#allocation18_spill]] %s1033_s0 }
   0x2   :  { %1040 = sst [smem:[#allocation19_spill]] %s1034_s1 }
   0x3   :  { %1041 = sst [smem:[#allocation20_spill]] %s1035_s2 }
   0x4   :  { %9 = vsyncpa [#allocation5], 0 }
   0x5   :  { %10 = vsyncpa [#allocation7], 0 }
   0x6   :  { %11 = vsyncpa [#allocation3], 0 }
   0x7   :  { %13 = vsyncpa [#allocation3 + $0x1], 0 }
   0x8   :  { %14 = vsyncpa [#allocation10], 0 }
   0x9   :  { %16 = vsyncpa [#allocation10 + $0x1], 0 }
   0xa   :  { %17 = vsyncpa [#allocation4], 0 }
   0xb   :  { %19 = vsyncpa [#allocation4 + $0x1], 0  ;;  %s837_s15 = smov 0   ;;  %s839_s16 = smov 0  }
   0xc   :  { %s841_s17 = smov 0   ;;  %s843_s18 = smov 0  }
   0xd   :  { %s845_s19 = smov 0   ;;  %s847_s20 = smov 0  }
   0xe LB: > { %s501_s21 = sadd.s32 4294967295, %s804_s20   ;;  %s502_s22 = sadd.s32 4294967294, %s804_s20   ;;  %s804_s20 = sphi %s847_s20, %s25_s20   ;;  %s800_s19 = sphi %s845_s19, %s1058_s19   ;;  %s796_s18 = sphi %s843_s18, %s1057_s18   ;;  %s792_s17 = sphi %s841_s17, %s1056_s17   ;;  %s788_s16 = sphi %s839_s16, %s1055_s16   ;;  %s784_s15 = sphi %s837_s15, %s1054_s15  }
   0xf   : > { %s88_s23 = sadd.s32 1, %s792_s17  ;;  %p95_p0 = scmp.ne.s32.totalorder %s792_s17, %s788_s16 }
  0x10   : > { %p96_p1 = scmp.eq.s32.totalorder %s804_s20, 0  ;;  %p101_p2 = scmp.ne.s32.totalorder %s788_s16, %s784_s15 }
  0x11   : > { %p875_p3 = scmp.eq.s32.totalorder %s501_s21, 0  ;;  %p155_p4 = scmp.eq.s32.totalorder %s501_s21, 1 }
  0x12   : > { %p879_p5 = por %p96_p1, %p95_p0  ;;  %p161_p6 = scmp.eq.s32.totalorder %s502_s22, 1 }
  0x13   : > { %p885_p7 = por %p875_p3, %p101_p2  ;;  %p889_p8 = por %p155_p4, %p95_p0 }
  0x14   : > { %p893_p9 = por %p161_p6, %p101_p2  ;;  %p503_p10 = scmp.ge.s32.totalorder %s804_s20, 1 }
  0x15   : > { %p168_p11 = scmp.lt.s32.totalorder %s804_s20, 3  ;;  %s1047_s0 = sld [smem:[#allocation18_spill]] }
  0x16   : > { %p506_p13 = scmp.ge.s32.totalorder %s804_s20, 2  ;;  %p560_p0 = scmp.lt.s32.totalorder %s804_s20, 2 }
  0x17   : > { %p902_p12 = pnand %p503_p10, %p168_p11  ;;  %s1049_s1 = sld [smem:[#allocation19_spill]] }
  0x18   : > { %p915_p2 = pnand %p560_p0, %p879_p5  ;;  %s806_s11 = smov [#allocation2]  }
  0x19   : > { %p540_p1 = pneg %p902_p12  ;;  %s807_s12 = smov [#allocation6]  }
  0x1a   : > { %s37_s13 = sadd.s32 1, %s800_s19  ;;  %s923_s14 = sand.u32 1, %s792_s17  }
  0x1b   : > { %s180_s5 = sshll.u32 %s1047_s0, 4  ;;  %p541_p4 = pnand %p540_p1, %p875_p3  ;;  %s181_s5 = int_to_ptr.hbm [resolvable:$true] %s180_s5 }
  0x1c   : > { %p39_p6 = scmp.ge.s32.totalorder %s37_s13, 2  ;;  %s522_s21 = smul.u32 6, %s923_s14 }
  0x1d   : > { %s190_s9 = sshll.u32 %s1049_s1, 4  ;;  %s523_s22 = smul.u32 6, %s800_s19  ;;  %s191_s9 = int_to_ptr.hbm [resolvable:$true] %s190_s9 }
  0x1e   : > { %543 = dma.hbm_to_smem (!%p541_p4), %s181_s5, 16, %s806_s11, [#allocation5]  }
  0x1f   : > { %546 = dma.hbm_to_smem (!%p541_p4), %s191_s9, 32, %s807_s12, [#allocation7]  }
  0x20   : > { %s1060_s13 = smov (%p39_p6, %s37_s13), 0  ;;  %s205_s29 = scalar_lea.vmem [#allocation8], %s522_s21 }
  0x21   : > { %1051 = sst [smem:[#allocation17_spill]] %s1060_s13  ;;  %s83_s25 = ssub.s32 %s800_s19, %s1060_s13 }
  0x22   : > { %s214_s30 = sshll.u32 %s205_s29, 4  ;;  %p86_p5 = scmp.eq.s32.totalorder %s83_s25, 0  ;;  %s215_s30 = int_to_ptr.vmem [resolvable:$true] %s214_s30 }
  0x23   : > { %s1052_s2 = sld [smem:[#allocation20_spill]]  ;;  %s202_s12 = scalar_lea.sflag [#allocation3], %s923_s14 }
  0x24   : > { %s937_s11 = scalar_select %p86_p5, %s792_s17, %s88_s23  }
  0x25   : > { %s808_s0 = smov 32   ;;  %s809_s1 = smov 2  }
  0x26   : > { %s508_s21 = sshll.u32 %s923_s14, 1  ;;  %s509_s29 = sshll.u32 %s800_s19, 1 }
  0x27   : > { %s233_s5 = scalar_lea.hbm %s1036_s3, %s509_s29 }
  0x29   : > { %s211_s8 = scalar_lea.hbm %s1052_s2, %s523_s22  ;;  %s228_s22 = scalar_lea.vmem [#allocation9], %s508_s21 }
  0x2a   : > { %s212_s9 = sshll.u32 %s211_s8, 4  ;;  %s237_s7 = sshll.u32 %s228_s22, 4  ;;  %s213_s9 = int_to_ptr.hbm [resolvable:$true] %s212_s9  ;;  %s238_s7 = int_to_ptr.vmem [resolvable:$true] %s237_s7 }
  0x2b   : > { %550 = dma.hbm_to_vmem [thread:$0]  (!%p915_p2), %s213_s9, 96, %s215_s30, %s202_s12, %s808_s0, %s808_s0, %s809_s1  }
  0x2c   : > { %s235_s8 = sshll.u32 %s233_s5, 4  ;;  %s225_s2 = scalar_lea.sflag [#allocation10], %s923_s14  ;;  %s236_s8 = int_to_ptr.hbm [resolvable:$true] %s235_s8 }
  0x2d   : > { %553 = dma.hbm_to_vmem [thread:$0]  (!%p915_p2), %s236_s8, 32, %s238_s7, %s225_s2  }
  0x2e   : > { %246 = sbr.rel (%p902_p12) target bundleno = 104 (0x68), region = 36 }
  0x33   : > { %763 = dma.done.wait (%p875_p3), [#allocation5], 16  }
  0x34   : > { %765 = vsyncadd (%p875_p3), [#allocation5], 4294967280 }
  0x35   : > { %767 = dma.done.wait (%p875_p3), [#allocation7], 32  }
  0x36   : > { %769 = vsyncadd (%p875_p3), [#allocation7], 4294967264  ;;  %s961_s0 = sand.u32 1, %s788_s16  }
  0x37   : > { %s524_s1 = smul.u32 6, %s961_s0  ;;  %s259_s2 = scalar_lea.sflag [#allocation3], %s961_s0 }
  0x39   : > { %s967_s23 = scalar_lea.vmem [#allocation8], %s524_s1 }
  0x3a   : > { %771 = dma.done.wait (%p885_p7), %s259_s2, 96  }
  0x3b   : > { %773 = vsyncadd (%p885_p7), %s259_s2, 4294967200  ;;  %s513_s24 = sshll.u32 %s961_s0, 1  ;;  %s269_s6 = scalar_lea.sflag [#allocation10], %s961_s0 }
  0x3c   : > { %s272_s10 = scalar_lea.vmem [#allocation9], %s513_s24 }
  0x3d   : > { %775 = dma.done.wait (%p885_p7), %s269_s6, 32  }
  0x3e   : > { %777 = vsyncadd (%p885_p7), %s269_s6, 4294967264 }
  0x3f   : > { %278 = sfence }
  0x40   : > { %s304_s13 = sld [smem:[#allocation2 + %s796_s18]]  ;;  %v305_v0 = vld [vmem:[%s272_s10] sm:$0x3]  ;;  %s514_s14 = sshll.u32 %s796_s18, 7  ;;  %v327_v11 = vld [vmem:[%s967_s23] sm:$0x3] }
  0x41   : > { %s333_s30 = sadd.s32 1, %s514_s14  ;;  %s343_s9 = sadd.s32 2, %s514_s14  ;;  %v515_v12 = vld [vmem:[%s967_s23 + $0x2] sm:$0x3]  ;;  %v517_v14 = vld [vmem:[%s967_s23 + $0x4] sm:$0x3] }
  0x42   : > { %s981_s12 = sld [smem:[#allocation6 + %s514_s14]]  ;;  %s525_s29 = smul.u32 6, %s796_s18 }
  0x43   : > { %s983_s26 = sld [smem:[#allocation6 + %s333_s30]]  ;;  %s303_s7 = scalar_lea.vmem [#allocation11], %s524_s1 }
  0x44   : > { %s985_s21 = sld [smem:[#allocation6 + %s343_s9]]  ;;  %s366_s22 = scalar_lea.hbm %s1037_s4, %s525_s29 }
  0x45   : > { %s367_s8 = sshll.u32 %s303_s7, 4  ;;  %s369_s18 = sshll.u32 %s366_s22, 4  ;;  %s368_s8 = int_to_ptr.vmem [resolvable:$true] %s367_s8  ;;  %s370_s18 = int_to_ptr.hbm [resolvable:$true] %s369_s18 }
  0x46   : > { %v306_v1 = vstv %s304_s13  ;;  %s354_s2 = scalar_lea.sflag [#allocation4], %s961_s0  ;;  %s724_s23 = sshra.s32 %s370_s18, 4  ;;  %s725_s23 = int_to_ptr.hbm [resolvable:$true] %s724_s23 }
  0x47   : > { %v307_v2 = vmul.f32 %v306_v1, %v305_v0  ;;  %s726_s24 = scalar_lea.hbm %s725_s23, 6  ;;  %s730_s10 = scalar_lea.hbm %s1037_s4, 12 }
  0x48   : > { %v328_v8 = vstv %s981_s12  ;;  %p727_p3 = scmp.ne.s32.totalorder %s725_s23, %s726_s24  ;;  %p731_p11 = scmp.lt.s32.totalorder %s725_s23, %s1037_s4 }
  0x49   : > { %v308_v3 = vsub.f32 1.0, %v307_v2  ;;  %v337_v13 = vstv %s983_s26  ;;  %v329_v18 = vsub.f32 %v327_v11, %v328_v8  ;;  %p732_p12 = scmp.lt.s32.totalorder %s730_s10, %s726_s24 }
  0x4a   : > { %v347_v15 = vstv %s985_s21  ;;  %v338_v20 = vsub.f32 %v515_v12, %v337_v13  ;;  %p728_p7 = pnand %p727_p3, %p889_p8 }
  0x4b   : > { %v309_v4 = vmax.f32 %v308_v3, 0.01  ;;  %v348_v21 = vsub.f32 %v517_v14, %v347_v15  ;;  %p733_p0 = por %p732_p12, %p731_p11 }
  0x4c   : > { %p729_p10 = pneg %p728_p7 }
  0x4d   : > { %618 = vrcp.f32 %v309_v4  ;;  %v321_v7 = vand.u32 2147483648, %v309_v4  ;;  %vm315_vm0 = vweird.f32 %v309_v4  ;;  %v319_v10 = vand.u32 2147483647, %v309_v4 }
  0x4e   : > { %p734_p1 = pnand %p733_p0, %p729_p10 }
  0x4f   : > { %v322_v17 = vor.u32 1.1754944e-38, %v321_v7  ;;  %vm320_vm3 = vcmp.eq.f32.partialorder %v319_v10, 8.507059e+37 }
  0x53   : > { %v619_v5 = vpop.eup %618 }
  0x54   : > { %v311_v6 = vmul.f32 %v619_v5, %v309_v4  ;;  %vm316_vm1 = vweird.f32 %v619_v5 }
  0x55   : > { %vm317_vm2 = vmor %vm315_vm0, %vm316_vm1 }
  0x56   : > { %v312_v9 = vsub.f32 1.0, %v311_v6 }
  0x58   : > { %v313_v16 = vmul.f32 %v619_v5, %v312_v9 }
  0x5a   : > { %v314_v19 = vadd.f32 %v619_v5, %v313_v16 }
  0x5c   : > { %v318_v22 = vsel %vm317_vm2, %v619_v5, %v314_v19 }
  0x5d   : > { %v323_v23 = vsel %vm320_vm3, %v322_v17, %v318_v22 }
  0x5e   : > { %v330_v24 = vmul.f32 %v329_v18, %v323_v23  ;;  %v339_v25 = vmul.f32 %v338_v20, %v323_v23  ;;  %v349_v26 = vmul.f32 %v348_v21, %v323_v23 }
  0x60   : > { %v331_v27 = vadd.f32 %v330_v24, %v328_v8  ;;  %v340_v28 = vadd.f32 %v339_v25, %v337_v13  ;;  %v350_v29 = vadd.f32 %v349_v26, %v347_v15 }
  0x62   : > { %332 = vst [vmem:[%s303_s7] sm:$0x3] %v331_v27 }
  0x63   : > { %516 = vst [vmem:[%s303_s7 + $0x2] sm:$0x3] %v340_v28 }
  0x64   : > { %518 = vst [vmem:[%s303_s7 + $0x4] sm:$0x3] %v350_v29 }
  0x65   : > { %737 = shalt.err (!%p734_p1)
}
  0x66   : > { %s810_s0 = smov 32   ;;  %s811_s30 = smov 2  }
  0x67   : > { %538 = dma.vmem_to_hbm [thread:$0]  (%p889_p8), %s368_s8, 96, %s370_s18, %s354_s2, %s810_s0, %s810_s0, %s811_s30  }
  0x68 PF: > { %s384_s9 = sand.u32 1, %s784_s15   ;;  %p555_p2 = pnand %p506_p13, %p893_p9 }
  0x69   : > { %s385_s12 = scalar_lea.sflag [#allocation4], %s384_s9 }
  0x6a   : > { %p556_p4 = pneg %p555_p2 }
  0x6c   : > { %779 = dma.done.wait (%p556_p4), %s385_s12, 96  }
  0x6d   : > { %781 = vsyncadd (%p556_p4), %s385_s12, 4294967200  ;;  %s25_s20 = sadd.s32 1, %s804_s20   ;;  %s1053_s27 = sld [smem:[#allocation17_spill]] }
  0x6e   : > { %p22_p6 = scmp.ge.s32.totalorder %s25_s20, 4   ;;  %s1054_s15 = smov %s788_s16 }
  0x6f   : > { %s1055_s16 = smov %s792_s17  ;;  %s1056_s17 = smov %s937_s11 }
  0x70   : > { %s1057_s18 = smov %s800_s19  ;;  %24 = sbr.rel (!%p22_p6) target bundleno = 14 (0xe), region = 107 }
  0x73   : > { %s1058_s19 = smov %s1053_s27 }
  0x75   :  { %391 = vsyncpa [#allocation3], 1 }
  0x76   :  { %393 = vsyncpa [#allocation3 + $0x1], 1 }
  0x77   :  { %394 = vsyncpa [#allocation10], 1 }
  0x78   :  { %396 = vsyncpa [#allocation10 + $0x1], 1 }
  0x79   :  { %397 = vsyncpa [#allocation4], 1 }
  0x7a   :  { %399 = vsyncpa [#allocation4 + $0x1], 1 }
  0x7b   :  { %400 = vsyncpa [#allocation5], 1 }
  0x7c   :  { %402 = vsyncpa [#allocation5 + $0x1], 1 }
  0x7d   :  { %403 = vsyncpa [#allocation7], 1 }

</bundles_post_ra>
